<compile_context>
chip_gen: v6e
topology: v6e:2x2x1
jax: 0.10.0
libtpu: 0.0.40
codegen_flags: <defaults>
</compile_context>

<pallas_src>
import functools

import jax
import jax.numpy as jnp
import numpy as np
from jax import lax
from jax.experimental import pallas as pl
from jax.experimental.pallas import tpu as pltpu

EPS = 1e-5  # PyTorch nn.LayerNorm default


def _layernorm(x, gamma, beta):
    mean = jnp.mean(x, axis=-1, keepdims=True)
    var = jnp.mean((x - mean) ** 2, axis=-1, keepdims=True)  # biased, like nn.LayerNorm
    return (x - mean) * lax.rsqrt(var + EPS) * gamma + beta


def encoder_block_kernel(
    x_ref,
    wqkv_ref, bqkv_ref, wo_ref, bo_ref,
    w1_ref, b1_ref, w2_ref, b2_ref,
    g1_ref, be1_ref, g2_ref, be2_ref,
    out_ref,
    *, n_heads, block_b, seq_len,
):
    Bb, S, H = block_b, seq_len, n_heads
    E = out_ref.shape[-1]
    dh = E // H
    M = Bb * S

    # Flatten the batch block so every matmul sees M = Bb*S rows (leading-dim merge only,
    # lane dim untouched).  f32 copy kept for residuals / LayerNorm.
    x = x_ref[...].reshape(M, E)
    x_bf = x.astype(jnp.bfloat16)

    # ---- fused QKV projection: one (M,E)@(E,3E) MXU matmul, f32 accumulate.
    #      1/sqrt(dh) is folded into the Q columns by the wrapper. ----
    qkv = jnp.dot(x_bf, wqkv_ref[...], preferred_element_type=jnp.float32) + bqkv_ref[...]
    # bf16 BEFORE any head shuffling: halves the bytes moved by the regroup.
    qkv_bf = qkv.astype(jnp.bfloat16).reshape(Bb, S, 3 * E)

    def heads(base):
        # (Bb, S, 3E) slab -> (Bb*H, S, dh): H static lane-slices + one stack along a
        # major axis + a leading-dim merge.  No lane<->sublane transposes.
        return jnp.stack(
            [qkv_bf[:, :, base + h * dh: base + (h + 1) * dh] for h in range(H)],
            axis=1,
        ).reshape(Bb * H, S, dh)

    q3 = heads(0)
    k3 = heads(E)
    v3 = heads(2 * E)

    # ---- batched attention: two einsum contractions over the (Bb*H) batch axis ----
    s = jnp.einsum("bqd,bkd->bqk", q3, k3, preferred_element_type=jnp.float32)
    s = s - jnp.max(s, axis=-1, keepdims=True)
    p = jnp.exp(s)
    p = p * pl.reciprocal(jnp.sum(p, axis=-1, keepdims=True), approx=True)  # EUP
    o3 = jnp.einsum("bqk,bkd->bqd", p.astype(jnp.bfloat16), v3,
                    preferred_element_type=jnp.float32)        # (Bb*H, S, dh) f32

    # ---- reassemble heads -> (M, E): bf16 first, then one lane-axis concat ----
    o4 = o3.astype(jnp.bfloat16).reshape(Bb, H, S, dh)
    attn_bf = jnp.concatenate([o4[:, h] for h in range(H)], axis=-1).reshape(M, E)

    # ---- out projection + residual + LayerNorm1 (f32 elementwise) ----
    attn = jnp.dot(attn_bf, wo_ref[...], preferred_element_type=jnp.float32) + bo_ref[...]
    x1 = _layernorm(attn + x, g1_ref[...], be1_ref[...])

    # ---- FFN: relu(linear1) -> linear2, residual + LayerNorm2 ----
    h1 = jnp.dot(x1.astype(jnp.bfloat16), w1_ref[...],
                 preferred_element_type=jnp.float32) + b1_ref[...]
    h1 = jnp.maximum(h1, 0.0)
    h2 = jnp.dot(h1.astype(jnp.bfloat16), w2_ref[...],
                 preferred_element_type=jnp.float32) + b2_ref[...]
    x2 = _layernorm(h2 + x1, g2_ref[...], be2_ref[...])

    out_ref[...] = x2.reshape(Bb, S, E)


def _vmem_bytes_estimate(block_b, S, E, F, H, weight_bytes):
    """Rough per-grid-step live-set estimate (used to size block_b / vmem limit)."""
    M = block_b * S
    io = 2 * 2 * block_b * S * E * 4            # double-buffered input + output blocks
    inter = (M * 3 * E * 6                      # fused qkv (f32 + bf16 copy)
             + 3 * M * E * 2                    # q3/k3/v3 head batches (bf16)
             + 2 * block_b * H * S * S * 4      # scores + probabilities (f32)
             + M * E * 6                        # attention output (f32 + bf16)
             + 3 * M * E * 4                    # residual / layernorm temporaries
             + M * F * 6)                       # FFN hidden (f32 + bf16)
    return io + weight_bytes + inter


def _choose_block_b(B, S, E, F, H, weight_bytes, vmem_cap_bytes):
    """Largest divisor of B with grid >= 2 (v7x megacore + pipelining) that fits VMEM.

    For real workloads pick B/S large enough that M = block_b*S >= 256-512 to fill the
    MXU rows on v5e/v6e; tiny test shapes cannot reach that.
    """
    budget = vmem_cap_bytes // 2                 # headroom for compiler scratch
    divisors = [d for d in range(1, B + 1) if B % d == 0]
    candidates = [d for d in divisors if d <= max(1, B // 2)] or [1]
    for d in sorted(candidates, reverse=True):
        if _vmem_bytes_estimate(d, S, E, F, H, weight_bytes) <= budget:
            return d
    return 1


def init_params(key, embed_dim, n_heads, dim_ff):
    """Deterministic synthetic parameters matching nn.MultiheadAttention + FFN shapes."""
    ks = jax.random.split(key, 8)
    s = 0.05
    wq = (jax.random.normal(ks[0], (embed_dim, embed_dim)) * s).astype(jnp.float32)
    wk = (jax.random.normal(ks[1], (embed_dim, embed_dim)) * s).astype(jnp.float32)
    wv = (jax.random.normal(ks[2], (embed_dim, embed_dim)) * s).astype(jnp.float32)
    wo = (jax.random.normal(ks[3], (embed_dim, embed_dim)) * s).astype(jnp.float32)
    w1 = (jax.random.normal(ks[4], (embed_dim, dim_ff)) * s).astype(jnp.float32)
    w2 = (jax.random.normal(ks[5], (dim_ff, embed_dim)) * s).astype(jnp.float32)
    bq = (jax.random.normal(ks[6], (1, embed_dim)) * s).astype(jnp.float32)
    bk = jnp.zeros((1, embed_dim), jnp.float32)
    bv = (jax.random.normal(ks[7], (1, embed_dim)) * s).astype(jnp.float32)
    bo = jnp.zeros((1, embed_dim), jnp.float32)
    b1 = jnp.full((1, dim_ff), 0.01, jnp.float32)
    b2 = jnp.full((1, embed_dim), -0.01, jnp.float32)
    g1 = jnp.ones((1, embed_dim), jnp.float32)
    be1 = jnp.zeros((1, embed_dim), jnp.float32)
    g2 = jnp.ones((1, embed_dim), jnp.float32)
    be2 = jnp.zeros((1, embed_dim), jnp.float32)
    return dict(wq=wq, wk=wk, wv=wv, bq=bq, bk=bk, bv=bv, wo=wo, bo=bo,
                w1=w1, b1=b1, w2=w2, b2=b2, g1=g1, be1=be1, g2=g2, be2=be2)


def self_attention_block(x, params, n_heads, block_b=None,
                         vmem_cap_bytes=64 * 1024 * 1024):
    B, S, E = x.shape
    F_ = params["w1"].shape[1]
    assert E % n_heads == 0, "embed_dim must be divisible by n_heads"
    dh = E // n_heads
    scale = 1.0 / float(np.sqrt(dh))

    # Fuse QKV weights/biases (scale folded into the Q columns) and cast all matmul
    # weights to bf16 for the MXU; biases / LayerNorm params stay f32.
    wqkv = jnp.concatenate([params["wq"] * scale, params["wk"], params["wv"]], axis=1)
    bqkv = jnp.concatenate([params["bq"] * scale, params["bk"], params["bv"]], axis=1)
    kparams = {
        "wqkv": wqkv.astype(jnp.bfloat16),
        "bqkv": bqkv.astype(jnp.float32),
        "wo": params["wo"].astype(jnp.bfloat16),
        "bo": params["bo"],
        "w1": params["w1"].astype(jnp.bfloat16),
        "b1": params["b1"],
        "w2": params["w2"].astype(jnp.bfloat16),
        "b2": params["b2"],
        "g1": params["g1"], "be1": params["be1"],
        "g2": params["g2"], "be2": params["be2"],
    }
    p_order = ["wqkv", "bqkv", "wo", "bo", "w1", "b1", "w2", "b2",
               "g1", "be1", "g2", "be2"]
    weight_bytes = sum(int(np.prod(kparams[n].shape)) * kparams[n].dtype.itemsize
                       for n in p_order)

    if block_b is None:
        block_b = _choose_block_b(B, S, E, F_, n_heads, weight_bytes, vmem_cap_bytes)
    assert B % block_b == 0

    est = _vmem_bytes_estimate(block_b, S, E, F_, n_heads, weight_bytes)
    # Derive the scoped-VMEM limit from the block dims; cap at 64 MiB so the same
    # setting is safe on v7x (64 MiB physical VMEM).
    vmem_limit = int(min(max(2 * est, 32 * 1024 * 1024), vmem_cap_bytes))

    def const_spec(shape):
        nd = len(shape)
        # Grid-invariant operand: single-buffered (no wasted second VMEM copy).
        return pl.BlockSpec(shape, lambda b, _nd=nd: (0,) * _nd,
                            pipeline_mode=pl.Buffered(1))

    in_specs = [pl.BlockSpec((block_b, S, E), lambda b: (b, 0, 0))]
    in_specs += [const_spec(kparams[name].shape) for name in p_order]

    kernel = functools.partial(encoder_block_kernel, n_heads=n_heads,
                               block_b=block_b, seq_len=S)

    flops = (2 * B * S * E * (3 * E)             # fused QKV projection
             + 2 * B * n_heads * S * S * dh * 2  # scores + p@v
             + 2 * B * S * E * E                 # out projection
             + 2 * B * S * E * F_ * 2)           # FFN
    bytes_accessed = int(2 * B * S * E * 4 + weight_bytes)
    cost = pl.CostEstimate(flops=int(flops),
                           transcendentals=int(B * n_heads * S * S),
                           bytes_accessed=bytes_accessed)

    return pl.pallas_call(
        kernel,
        # TODO(synk): offer a bf16 output variant (halves HBM writeback) for consumers
        # that tolerate it; kept f32 here to match the PyTorch forward dtype.
        out_shape=jax.ShapeDtypeStruct((B, S, E), jnp.float32),
        grid_spec=pltpu.PrefetchScalarGridSpec(
            num_scalar_prefetch=0,
            grid=(B // block_b,),
            in_specs=in_specs,
            out_specs=pl.BlockSpec((block_b, S, E), lambda b: (b, 0, 0)),
        ),
        compiler_params=pltpu.CompilerParams(
            dimension_semantics=("parallel",),
            vmem_limit_bytes=vmem_limit,
        ),
        cost_estimate=cost,
    )(x, *[kparams[name] for name in p_order])


def reference(x, params, n_heads):
    """Pure-JAX f32 reference mirroring the PyTorch forward."""
    B, S, E = x.shape
    dh = E // n_heads
    scale = 1.0 / np.sqrt(dh)
    q = x @ params["wq"] + params["bq"]
    k = x @ params["wk"] + params["bk"]
    v = x @ params["wv"] + params["bv"]
    q = q.reshape(B, S, n_heads, dh).transpose(0, 2, 1, 3)
    k = k.reshape(B, S, n_heads, dh).transpose(0, 2, 1, 3)
    v = v.reshape(B, S, n_heads, dh).transpose(0, 2, 1, 3)
    s = jnp.einsum("bhqd,bhkd->bhqk", q, k) * scale
    p = jax.nn.softmax(s, axis=-1)
    attn = jnp.einsum("bhqk,bhkd->bhqd", p, v).transpose(0, 2, 1, 3).reshape(B, S, E)
    attn = attn @ params["wo"] + params["bo"]

    def ln(y, g, b):
        m = jnp.mean(y, -1, keepdims=True)
        var = jnp.mean((y - m) ** 2, -1, keepdims=True)
        return (y - m) / jnp.sqrt(var + EPS) * g + b

    x1 = ln(attn + x, params["g1"], params["be1"])
    h = jnp.maximum(x1 @ params["w1"] + params["b1"], 0.0)
    h = h @ params["w2"] + params["b2"]
    return ln(h + x1, params["g2"], params["be2"])


if __name__ == "__main__":
    B, S, E = 2, 8, 32
    n_heads, dim_ff = 4, 64

    key = jax.random.PRNGKey(0)
    kx, kp = jax.random.split(key)
    x = jax.random.normal(kx, (B, S, E), dtype=jnp.float32)
    params = init_params(kp, E, n_heads, dim_ff)

    out = self_attention_block(x, params, n_heads)   # block_b auto -> 1, grid = 2
    out = jax.block_until_ready(out)

    ref = jax.block_until_ready(reference(x, params, n_heads))
    assert out.shape == (B, S, E)
    # bf16 matmul inputs + approx reciprocal -> slightly looser tolerance than pure f32.
    np.testing.assert_allclose(np.asarray(out), np.asarray(ref), atol=2e-2, rtol=2e-2)

    print("KERNEL_OK")
</pallas_src>

<mosaic_0001>
module attributes {stable_mosaic.version = 11 : i64} {
  func.func @encoder_block_kernel(%arg0: i32, %arg1: memref<1x8x32xf32, #tpu.memory_space<vmem>>, %arg2: memref<32x96xbf16, #tpu.memory_space<vmem>>, %arg3: memref<1x96xf32, #tpu.memory_space<vmem>>, %arg4: memref<32x32xbf16, #tpu.memory_space<vmem>>, %arg5: memref<1x32xf32, #tpu.memory_space<vmem>>, %arg6: memref<32x64xbf16, #tpu.memory_space<vmem>>, %arg7: memref<1x64xf32, #tpu.memory_space<vmem>>, %arg8: memref<64x32xbf16, #tpu.memory_space<vmem>>, %arg9: memref<1x32xf32, #tpu.memory_space<vmem>>, %arg10: memref<1x32xf32, #tpu.memory_space<vmem>>, %arg11: memref<1x32xf32, #tpu.memory_space<vmem>>, %arg12: memref<1x32xf32, #tpu.memory_space<vmem>>, %arg13: memref<1x32xf32, #tpu.memory_space<vmem>>, %arg14: memref<1x8x32xf32, #tpu.memory_space<vmem>>) attributes {dimension_semantics = [#tpu.dimension_semantics<parallel>], iteration_bounds = array<i64: 2>, scalar_prefetch = 0 : i64, scratch_operands = 0 : i64, tpu.core_type = #tpu.core_type<tc>, window_params = [{transform_indices = @transform_0, window_bounds = array<i64: 1, 8, 32>}, {pipeline_mode = #tpu.pipeline_mode<synchronous>, transform_indices = @transform_1, window_bounds = array<i64: 32, 96>}, {pipeline_mode = #tpu.pipeline_mode<synchronous>, transform_indices = @transform_2, window_bounds = array<i64: 1, 96>}, {pipeline_mode = #tpu.pipeline_mode<synchronous>, transform_indices = @transform_3, window_bounds = array<i64: 32, 32>}, {pipeline_mode = #tpu.pipeline_mode<synchronous>, transform_indices = @transform_4, window_bounds = array<i64: 1, 32>}, {pipeline_mode = #tpu.pipeline_mode<synchronous>, transform_indices = @transform_5, window_bounds = array<i64: 32, 64>}, {pipeline_mode = #tpu.pipeline_mode<synchronous>, transform_indices = @transform_6, window_bounds = array<i64: 1, 64>}, {pipeline_mode = #tpu.pipeline_mode<synchronous>, transform_indices = @transform_7, window_bounds = array<i64: 64, 32>}, {pipeline_mode = #tpu.pipeline_mode<synchronous>, transform_indices = @transform_8, window_bounds = array<i64: 1, 32>}, {pipeline_mode = #tpu.pipeline_mode<synchronous>, transform_indices = @transform_9, window_bounds = array<i64: 1, 32>}, {pipeline_mode = #tpu.pipeline_mode<synchronous>, transform_indices = @transform_10, window_bounds = array<i64: 1, 32>}, {pipeline_mode = #tpu.pipeline_mode<synchronous>, transform_indices = @transform_11, window_bounds = array<i64: 1, 32>}, {pipeline_mode = #tpu.pipeline_mode<synchronous>, transform_indices = @transform_12, window_bounds = array<i64: 1, 32>}, {transform_indices = @transform_13, window_bounds = array<i64: 1, 8, 32>}]} {
    %c0 = arith.constant 0 : index
    %c0_0 = arith.constant 0 : index
    %c0_1 = arith.constant 0 : index
    %0 = vector.load %arg1[%c0, %c0_0, %c0_1] : memref<1x8x32xf32, #tpu.memory_space<vmem>>, vector<1x8x32xf32>
    %1 = vector.shape_cast %0 : vector<1x8x32xf32> to vector<8x32xf32>
    %2 = arith.truncf %1 : vector<8x32xf32> to vector<8x32xbf16>
    %c0_2 = arith.constant 0 : index
    %c0_3 = arith.constant 0 : index
    %3 = vector.load %arg2[%c0_2, %c0_3] : memref<32x96xbf16, #tpu.memory_space<vmem>>, vector<32x96xbf16>
    %cst = arith.constant dense<0.000000e+00> : vector<8x96xf32>
    %4 = tpu.matmul %2, %3, %cst {dimension_numbers = #tpu.dot_dimension_numbers<[1], [0], [0], [1], [0, 0, 1, 1], [], []>} : vector<8x32xbf16>, vector<32x96xbf16>, vector<8x96xf32> -> vector<8x96xf32>
    %c0_4 = arith.constant 0 : index
    %c0_5 = arith.constant 0 : index
    %5 = vector.load %arg3[%c0_4, %c0_5] : memref<1x96xf32, #tpu.memory_space<vmem>>, vector<1x96xf32>
    %6 = vector.broadcast %5 : vector<1x96xf32> to vector<8x96xf32>
    %7 = arith.addf %4, %6 : vector<8x96xf32>
    %8 = arith.truncf %7 : vector<8x96xf32> to vector<8x96xbf16>
    %9 = vector.shape_cast %8 : vector<8x96xbf16> to vector<1x8x96xbf16>
    %10 = vector.extract_strided_slice %9 {offsets = [0, 0, 0], sizes = [1, 8, 8], strides = [1, 1, 1]} : vector<1x8x96xbf16> to vector<1x8x8xbf16>
    %11 = vector.extract_strided_slice %9 {offsets = [0, 0, 8], sizes = [1, 8, 8], strides = [1, 1, 1]} : vector<1x8x96xbf16> to vector<1x8x8xbf16>
    %12 = vector.extract_strided_slice %9 {offsets = [0, 0, 16], sizes = [1, 8, 8], strides = [1, 1, 1]} : vector<1x8x96xbf16> to vector<1x8x8xbf16>
    %13 = vector.extract_strided_slice %9 {offsets = [0, 0, 24], sizes = [1, 8, 8], strides = [1, 1, 1]} : vector<1x8x96xbf16> to vector<1x8x8xbf16>
    %14 = vector.shape_cast %10 : vector<1x8x8xbf16> to vector<1x1x8x8xbf16>
    %15 = vector.shape_cast %11 : vector<1x8x8xbf16> to vector<1x1x8x8xbf16>
    %16 = vector.shape_cast %12 : vector<1x8x8xbf16> to vector<1x1x8x8xbf16>
    %17 = vector.shape_cast %13 : vector<1x8x8xbf16> to vector<1x1x8x8xbf16>
    %18 = tpu.concatenate %14, %15, %16, %17 in 1 : vector<1x1x8x8xbf16>, vector<1x1x8x8xbf16>, vector<1x1x8x8xbf16>, vector<1x1x8x8xbf16> -> vector<1x4x8x8xbf16>
    %19 = vector.shape_cast %18 : vector<1x4x8x8xbf16> to vector<4x8x8xbf16>
    %20 = vector.extract_strided_slice %9 {offsets = [0, 0, 32], sizes = [1, 8, 8], strides = [1, 1, 1]} : vector<1x8x96xbf16> to vector<1x8x8xbf16>
    %21 = vector.extract_strided_slice %9 {offsets = [0, 0, 40], sizes = [1, 8, 8], strides = [1, 1, 1]} : vector<1x8x96xbf16> to vector<1x8x8xbf16>
    %22 = vector.extract_strided_slice %9 {offsets = [0, 0, 48], sizes = [1, 8, 8], strides = [1, 1, 1]} : vector<1x8x96xbf16> to vector<1x8x8xbf16>
    %23 = vector.extract_strided_slice %9 {offsets = [0, 0, 56], sizes = [1, 8, 8], strides = [1, 1, 1]} : vector<1x8x96xbf16> to vector<1x8x8xbf16>
    %24 = vector.shape_cast %20 : vector<1x8x8xbf16> to vector<1x1x8x8xbf16>
    %25 = vector.shape_cast %21 : vector<1x8x8xbf16> to vector<1x1x8x8xbf16>
    %26 = vector.shape_cast %22 : vector<1x8x8xbf16> to vector<1x1x8x8xbf16>
    %27 = vector.shape_cast %23 : vector<1x8x8xbf16> to vector<1x1x8x8xbf16>
    %28 = tpu.concatenate %24, %25, %26, %27 in 1 : vector<1x1x8x8xbf16>, vector<1x1x8x8xbf16>, vector<1x1x8x8xbf16>, vector<1x1x8x8xbf16> -> vector<1x4x8x8xbf16>
    %29 = vector.shape_cast %28 : vector<1x4x8x8xbf16> to vector<4x8x8xbf16>
    %30 = vector.extract_strided_slice %9 {offsets = [0, 0, 64], sizes = [1, 8, 8], strides = [1, 1, 1]} : vector<1x8x96xbf16> to vector<1x8x8xbf16>
    %31 = vector.extract_strided_slice %9 {offsets = [0, 0, 72], sizes = [1, 8, 8], strides = [1, 1, 1]} : vector<1x8x96xbf16> to vector<1x8x8xbf16>
    %32 = vector.extract_strided_slice %9 {offsets = [0, 0, 80], sizes = [1, 8, 8], strides = [1, 1, 1]} : vector<1x8x96xbf16> to vector<1x8x8xbf16>
    %33 = vector.extract_strided_slice %9 {offsets = [0, 0, 88], sizes = [1, 8, 8], strides = [1, 1, 1]} : vector<1x8x96xbf16> to vector<1x8x8xbf16>
    %34 = vector.shape_cast %30 : vector<1x8x8xbf16> to vector<1x1x8x8xbf16>
    %35 = vector.shape_cast %31 : vector<1x8x8xbf16> to vector<1x1x8x8xbf16>
    %36 = vector.shape_cast %32 : vector<1x8x8xbf16> to vector<1x1x8x8xbf16>
    %37 = vector.shape_cast %33 : vector<1x8x8xbf16> to vector<1x1x8x8xbf16>
    %38 = tpu.concatenate %34, %35, %36, %37 in 1 : vector<1x1x8x8xbf16>, vector<1x1x8x8xbf16>, vector<1x1x8x8xbf16>, vector<1x1x8x8xbf16> -> vector<1x4x8x8xbf16>
    %39 = vector.shape_cast %38 : vector<1x4x8x8xbf16> to vector<4x8x8xbf16>
    "tpu.trace_start"() <{level = 10 : i32, message = "bqd,bkd->bqk"}> : () -> ()
    %cst_6 = arith.constant dense<0.000000e+00> : vector<4x8x8xf32>
    %40 = tpu.matmul %19, %29, %cst_6 {dimension_numbers = #tpu.dot_dimension_numbers<[2], [2], [1], [1], [0, 0, 0, 1, 1, 1], [0], [0]>} : vector<4x8x8xbf16>, vector<4x8x8xbf16>, vector<4x8x8xf32> -> vector<4x8x8xf32>
    "tpu.trace_stop"() : () -> ()
    %cst_7 = arith.constant dense<0xFF800000> : vector<4x8xf32>
    %41 = vector.multi_reduction <maximumf>, %40, %cst_7 [2] : vector<4x8x8xf32> to vector<4x8xf32>
    %42 = vector.shape_cast %41 : vector<4x8xf32> to vector<4x8x1xf32>
    %43 = vector.broadcast %42 : vector<4x8x1xf32> to vector<4x8x8xf32>
    %44 = arith.subf %40, %43 : vector<4x8x8xf32>
    %45 = math.exp %44 : vector<4x8x8xf32>
    %cst_8 = arith.constant dense<0.000000e+00> : vector<4x8xf32>
    %46 = vector.multi_reduction <add>, %45, %cst_8 [2] : vector<4x8x8xf32> to vector<4x8xf32>
    %47 = vector.shape_cast %46 : vector<4x8xf32> to vector<4x8x1xf32>
    %48 = tpu.reciprocal %47 {approx = true} : vector<4x8x1xf32> -> vector<4x8x1xf32>
    %49 = vector.broadcast %48 : vector<4x8x1xf32> to vector<4x8x8xf32>
    %50 = arith.mulf %45, %49 : vector<4x8x8xf32>
    %51 = arith.truncf %50 : vector<4x8x8xf32> to vector<4x8x8xbf16>
    "tpu.trace_start"() <{level = 10 : i32, message = "bqk,bkd->bqd"}> : () -> ()
    %cst_9 = arith.constant dense<0.000000e+00> : vector<4x8x8xf32>
    %52 = tpu.matmul %51, %39, %cst_9 {dimension_numbers = #tpu.dot_dimension_numbers<[2], [1], [1], [2], [0, 0, 0, 1, 1, 2], [0], [0]>} : vector<4x8x8xbf16>, vector<4x8x8xbf16>, vector<4x8x8xf32> -> vector<4x8x8xf32>
    "tpu.trace_stop"() : () -> ()
    %53 = arith.truncf %52 : vector<4x8x8xf32> to vector<4x8x8xbf16>
    %54 = vector.shape_cast %53 : vector<4x8x8xbf16> to vector<1x4x8x8xbf16>
    %55 = vector.extract_strided_slice %54 {offsets = [0, 0, 0, 0], sizes = [1, 1, 8, 8], strides = [1, 1, 1, 1]} : vector<1x4x8x8xbf16> to vector<1x1x8x8xbf16>
    %56 = vector.shape_cast %55 : vector<1x1x8x8xbf16> to vector<1x8x8xbf16>
    %57 = vector.extract_strided_slice %54 {offsets = [0, 1, 0, 0], sizes = [1, 1, 8, 8], strides = [1, 1, 1, 1]} : vector<1x4x8x8xbf16> to vector<1x1x8x8xbf16>
    %58 = vector.shape_cast %57 : vector<1x1x8x8xbf16> to vector<1x8x8xbf16>
    %59 = vector.extract_strided_slice %54 {offsets = [0, 2, 0, 0], sizes = [1, 1, 8, 8], strides = [1, 1, 1, 1]} : vector<1x4x8x8xbf16> to vector<1x1x8x8xbf16>
    %60 = vector.shape_cast %59 : vector<1x1x8x8xbf16> to vector<1x8x8xbf16>
    %61 = vector.extract_strided_slice %54 {offsets = [0, 3, 0, 0], sizes = [1, 1, 8, 8], strides = [1, 1, 1, 1]} : vector<1x4x8x8xbf16> to vector<1x1x8x8xbf16>
    %62 = vector.shape_cast %61 : vector<1x1x8x8xbf16> to vector<1x8x8xbf16>
    %63 = tpu.concatenate %56, %58, %60, %62 in 2 : vector<1x8x8xbf16>, vector<1x8x8xbf16>, vector<1x8x8xbf16>, vector<1x8x8xbf16> -> vector<1x8x32xbf16>
    %64 = vector.shape_cast %63 : vector<1x8x32xbf16> to vector<8x32xbf16>
    %c0_10 = arith.constant 0 : index
    %c0_11 = arith.constant 0 : index
    %65 = vector.load %arg4[%c0_10, %c0_11] : memref<32x32xbf16, #tpu.memory_space<vmem>>, vector<32x32xbf16>
    %cst_12 = arith.constant dense<0.000000e+00> : vector<8x32xf32>
    %66 = tpu.matmul %64, %65, %cst_12 {dimension_numbers = #tpu.dot_dimension_numbers<[1], [0], [0], [1], [0, 0, 1, 1], [], []>} : vector<8x32xbf16>, vector<32x32xbf16>, vector<8x32xf32> -> vector<8x32xf32>
    %c0_13 = arith.constant 0 : index
    %c0_14 = arith.constant 0 : index
    %67 = vector.load %arg5[%c0_13, %c0_14] : memref<1x32xf32, #tpu.memory_space<vmem>>, vector<1x32xf32>
    %68 = vector.broadcast %67 : vector<1x32xf32> to vector<8x32xf32>
    %69 = arith.addf %66, %68 : vector<8x32xf32>
    %70 = arith.addf %69, %1 : vector<8x32xf32>
    %c0_15 = arith.constant 0 : index
    %c0_16 = arith.constant 0 : index
    %71 = vector.load %arg10[%c0_15, %c0_16] : memref<1x32xf32, #tpu.memory_space<vmem>>, vector<1x32xf32>
    %c0_17 = arith.constant 0 : index
    %c0_18 = arith.constant 0 : index
    %72 = vector.load %arg11[%c0_17, %c0_18] : memref<1x32xf32, #tpu.memory_space<vmem>>, vector<1x32xf32>
    %cst_19 = arith.constant dense<0.000000e+00> : vector<8xf32>
    %73 = vector.multi_reduction <add>, %70, %cst_19 [1] : vector<8x32xf32> to vector<8xf32>
    %74 = vector.shape_cast %73 : vector<8xf32> to vector<8x1xf32>
    %cst_20 = arith.constant 3.200000e+01 : f32
    %75 = vector.broadcast %cst_20 : f32 to vector<8x1xf32>
    %76 = arith.divf %74, %75 : vector<8x1xf32>
    %77 = vector.broadcast %76 : vector<8x1xf32> to vector<8x32xf32>
    %78 = arith.subf %70, %77 : vector<8x32xf32>
    %79 = arith.mulf %78, %78 : vector<8x32xf32>
    %cst_21 = arith.constant dense<0.000000e+00> : vector<8xf32>
    %80 = vector.multi_reduction <add>, %79, %cst_21 [1] : vector<8x32xf32> to vector<8xf32>
    %81 = vector.shape_cast %80 : vector<8xf32> to vector<8x1xf32>
    %cst_22 = arith.constant 3.200000e+01 : f32
    %82 = vector.broadcast %cst_22 : f32 to vector<8x1xf32>
    %83 = arith.divf %81, %82 : vector<8x1xf32>
    %84 = vector.broadcast %76 : vector<8x1xf32> to vector<8x32xf32>
    %85 = arith.subf %70, %84 : vector<8x32xf32>
    %cst_23 = arith.constant 9.99999974E-6 : f32
    %86 = vector.broadcast %cst_23 : f32 to vector<8x1xf32>
    %87 = arith.addf %83, %86 : vector<8x1xf32>
    %88 = math.rsqrt %87 : vector<8x1xf32>
    %89 = vector.broadcast %88 : vector<8x1xf32> to vector<8x32xf32>
    %90 = arith.mulf %85, %89 : vector<8x32xf32>
    %91 = vector.broadcast %71 : vector<1x32xf32> to vector<8x32xf32>
    %92 = arith.mulf %90, %91 : vector<8x32xf32>
    %93 = vector.broadcast %72 : vector<1x32xf32> to vector<8x32xf32>
    %94 = arith.addf %92, %93 : vector<8x32xf32>
    %95 = arith.truncf %94 : vector<8x32xf32> to vector<8x32xbf16>
    %c0_24 = arith.constant 0 : index
    %c0_25 = arith.constant 0 : index
    %96 = vector.load %arg6[%c0_24, %c0_25] : memref<32x64xbf16, #tpu.memory_space<vmem>>, vector<32x64xbf16>
    %cst_26 = arith.constant dense<0.000000e+00> : vector<8x64xf32>
    %97 = tpu.matmul %95, %96, %cst_26 {dimension_numbers = #tpu.dot_dimension_numbers<[1], [0], [0], [1], [0, 0, 1, 1], [], []>} : vector<8x32xbf16>, vector<32x64xbf16>, vector<8x64xf32> -> vector<8x64xf32>
    %c0_27 = arith.constant 0 : index
    %c0_28 = arith.constant 0 : index
    %98 = vector.load %arg7[%c0_27, %c0_28] : memref<1x64xf32, #tpu.memory_space<vmem>>, vector<1x64xf32>
    %99 = vector.broadcast %98 : vector<1x64xf32> to vector<8x64xf32>
    %100 = arith.addf %97, %99 : vector<8x64xf32>
    %cst_29 = arith.constant 0.000000e+00 : f32
    %101 = vector.broadcast %cst_29 : f32 to vector<8x64xf32>
    %102 = arith.maximumf %100, %101 : vector<8x64xf32>
    %103 = arith.truncf %102 : vector<8x64xf32> to vector<8x64xbf16>
    %c0_30 = arith.constant 0 : index
    %c0_31 = arith.constant 0 : index
    %104 = vector.load %arg8[%c0_30, %c0_31] : memref<64x32xbf16, #tpu.memory_space<vmem>>, vector<64x32xbf16>
    %cst_32 = arith.constant dense<0.000000e+00> : vector<8x32xf32>
    %105 = tpu.matmul %103, %104, %cst_32 {dimension_numbers = #tpu.dot_dimension_numbers<[1], [0], [0], [1], [0, 0, 1, 1], [], []>} : vector<8x64xbf16>, vector<64x32xbf16>, vector<8x32xf32> -> vector<8x32xf32>
    %c0_33 = arith.constant 0 : index
    %c0_34 = arith.constant 0 : index
    %106 = vector.load %arg9[%c0_33, %c0_34] : memref<1x32xf32, #tpu.memory_space<vmem>>, vector<1x32xf32>
    %107 = vector.broadcast %106 : vector<1x32xf32> to vector<8x32xf32>
    %108 = arith.addf %105, %107 : vector<8x32xf32>
    %109 = arith.addf %108, %94 : vector<8x32xf32>
    %c0_35 = arith.constant 0 : index
    %c0_36 = arith.constant 0 : index
    %110 = vector.load %arg12[%c0_35, %c0_36] : memref<1x32xf32, #tpu.memory_space<vmem>>, vector<1x32xf32>
    %c0_37 = arith.constant 0 : index
    %c0_38 = arith.constant 0 : index
    %111 = vector.load %arg13[%c0_37, %c0_38] : memref<1x32xf32, #tpu.memory_space<vmem>>, vector<1x32xf32>
    %cst_39 = arith.constant dense<0.000000e+00> : vector<8xf32>
    %112 = vector.multi_reduction <add>, %109, %cst_39 [1] : vector<8x32xf32> to vector<8xf32>
    %113 = vector.shape_cast %112 : vector<8xf32> to vector<8x1xf32>
    %cst_40 = arith.constant 3.200000e+01 : f32
    %114 = vector.broadcast %cst_40 : f32 to vector<8x1xf32>
    %115 = arith.divf %113, %114 : vector<8x1xf32>
    %116 = vector.broadcast %115 : vector<8x1xf32> to vector<8x32xf32>
    %117 = arith.subf %109, %116 : vector<8x32xf32>
    %118 = arith.mulf %117, %117 : vector<8x32xf32>
    %cst_41 = arith.constant dense<0.000000e+00> : vector<8xf32>
    %119 = vector.multi_reduction <add>, %118, %cst_41 [1] : vector<8x32xf32> to vector<8xf32>
    %120 = vector.shape_cast %119 : vector<8xf32> to vector<8x1xf32>
    %cst_42 = arith.constant 3.200000e+01 : f32
    %121 = vector.broadcast %cst_42 : f32 to vector<8x1xf32>
    %122 = arith.divf %120, %121 : vector<8x1xf32>
    %123 = vector.broadcast %115 : vector<8x1xf32> to vector<8x32xf32>
    %124 = arith.subf %109, %123 : vector<8x32xf32>
    %cst_43 = arith.constant 9.99999974E-6 : f32
    %125 = vector.broadcast %cst_43 : f32 to vector<8x1xf32>
    %126 = arith.addf %122, %125 : vector<8x1xf32>
    %127 = math.rsqrt %126 : vector<8x1xf32>
    %128 = vector.broadcast %127 : vector<8x1xf32> to vector<8x32xf32>
    %129 = arith.mulf %124, %128 : vector<8x32xf32>
    %130 = vector.broadcast %110 : vector<1x32xf32> to vector<8x32xf32>
    %131 = arith.mulf %129, %130 : vector<8x32xf32>
    %132 = vector.broadcast %111 : vector<1x32xf32> to vector<8x32xf32>
    %133 = arith.addf %131, %132 : vector<8x32xf32>
    %134 = vector.shape_cast %133 : vector<8x32xf32> to vector<1x8x32xf32>
    %c0_44 = arith.constant 0 : index
    %c0_45 = arith.constant 0 : index
    %c0_46 = arith.constant 0 : index
    %135 = vector.load %arg14[%c0_44, %c0_45, %c0_46] : memref<1x8x32xf32, #tpu.memory_space<vmem>>, vector<1x8x32xf32>
    tpu.vector_store %arg14[%c0_44, %c0_45, %c0_46], %134 {strides = array<i32>} : memref<1x8x32xf32, #tpu.memory_space<vmem>>, vector<1x8x32xf32>,
    return
  }
  func.func @transform_0(%arg0: i32) -> (i32, i32, i32) {
    %c0_i32 = arith.constant 0 : i32
    %c0_i32_0 = arith.constant 0 : i32
    %c0_i32_1 = arith.constant 0 : i32
    return %arg0, %c0_i32, %c0_i32_0 : i32, i32, i32
  }
  func.func @transform_1(%arg0: i32) -> (i32, i32) {
    %c0_i32 = arith.constant 0 : i32
    %c0_i32_0 = arith.constant 0 : i32
    %c0_i32_1 = arith.constant 0 : i32
    return %c0_i32, %c0_i32_0 : i32, i32
  }
  func.func @transform_2(%arg0: i32) -> (i32, i32) {
    %c0_i32 = arith.constant 0 : i32
    %c0_i32_0 = arith.constant 0 : i32
    %c0_i32_1 = arith.constant 0 : i32
    return %c0_i32, %c0_i32_0 : i32, i32
  }
  func.func @transform_3(%arg0: i32) -> (i32, i32) {
    %c0_i32 = arith.constant 0 : i32
    %c0_i32_0 = arith.constant 0 : i32
    %c0_i32_1 = arith.constant 0 : i32
    return %c0_i32, %c0_i32_0 : i32, i32
  }
  func.func @transform_4(%arg0: i32) -> (i32, i32) {
    %c0_i32 = arith.constant 0 : i32
    %c0_i32_0 = arith.constant 0 : i32
    %c0_i32_1 = arith.constant 0 : i32
    return %c0_i32, %c0_i32_0 : i32, i32
  }
  func.func @transform_5(%arg0: i32) -> (i32, i32) {
    %c0_i32 = arith.constant 0 : i32
    %c0_i32_0 = arith.constant 0 : i32
    %c0_i32_1 = arith.constant 0 : i32
    return %c0_i32, %c0_i32_0 : i32, i32
  }
  func.func @transform_6(%arg0: i32) -> (i32, i32) {
    %c0_i32 = arith.constant 0 : i32
    %c0_i32_0 = arith.constant 0 : i32
    %c0_i32_1 = arith.constant 0 : i32
    return %c0_i32, %c0_i32_0 : i32, i32
  }
  func.func @transform_7(%arg0: i32) -> (i32, i32) {
    %c0_i32 = arith.constant 0 : i32
    %c0_i32_0 = arith.constant 0 : i32
    %c0_i32_1 = arith.constant 0 : i32
    return %c0_i32, %c0_i32_0 : i32, i32
  }
  func.func @transform_8(%arg0: i32) -> (i32, i32) {
    %c0_i32 = arith.constant 0 : i32
    %c0_i32_0 = arith.constant 0 : i32
    %c0_i32_1 = arith.constant 0 : i32
    return %c0_i32, %c0_i32_0 : i32, i32
  }
  func.func @transform_9(%arg0: i32) -> (i32, i32) {
    %c0_i32 = arith.constant 0 : i32
    %c0_i32_0 = arith.constant 0 : i32
    %c0_i32_1 = arith.constant 0 : i32
    return %c0_i32, %c0_i32_0 : i32, i32
  }
  func.func @transform_10(%arg0: i32) -> (i32, i32) {
    %c0_i32 = arith.constant 0 : i32
    %c0_i32_0 = arith.constant 0 : i32
    %c0_i32_1 = arith.constant 0 : i32
    return %c0_i32, %c0_i32_0 : i32, i32
  }
  func.func @transform_11(%arg0: i32) -> (i32, i32) {
    %c0_i32 = arith.constant 0 : i32
    %c0_i32_0 = arith.constant 0 : i32
    %c0_i32_1 = arith.constant 0 : i32
    return %c0_i32, %c0_i32_0 : i32, i32
  }
  func.func @transform_12(%arg0: i32) -> (i32, i32) {
    %c0_i32 = arith.constant 0 : i32
    %c0_i32_0 = arith.constant 0 : i32
    %c0_i32_1 = arith.constant 0 : i32
    return %c0_i32, %c0_i32_0 : i32, i32
  }
  func.func @transform_13(%arg0: i32) -> (i32, i32, i32) {
    %c0_i32 = arith.constant 0 : i32
    %c0_i32_0 = arith.constant 0 : i32
    %c0_i32_1 = arith.constant 0 : i32
    return %arg0, %c0_i32, %c0_i32_0 : i32, i32, i32
  }
}

</mosaic_0001>

<bundles_post_ra>
// kernel: tpu_custom_call.1
= control target key start
LH: loop header
LB: loop body
LE: loop exit
PB: predicated region body
PF: predicated region fallthrough
CT: control target
= control target key end

     0   :  { %s2028_s0 = inlined_call_operand.vmem [shape: f32[2,8,32], index: 0, kind: input, shape index: {}]   ;;  %s2029_s1 = inlined_call_operand.vmem [shape: bf16[32,96], index: 1, kind: input, shape index: {}]   ;;  %s2030_s2 = inlined_call_operand.vmem [shape: f32[1,96], index: 2, kind: input, shape index: {}]   ;;  %s2031_s3 = inlined_call_operand.vmem [shape: bf16[32,32], index: 3, kind: input, shape index: {}]   ;;  %s2032_s4 = inlined_call_operand.vmem [shape: f32[1,32], index: 4, kind: input, shape index: {}]   ;;  %s2033_s5 = inlined_call_operand.hbm [shape: bf16[32,64], index: 5, kind: input, shape index: {}]   ;;  %s2034_s6 = inlined_call_operand.vmem [shape: f32[1,64], index: 6, kind: input, shape index: {}]   ;;  %s2035_s7 = inlined_call_operand.vmem [shape: bf16[64,32], index: 7, kind: input, shape index: {}]   ;;  %s2036_s8 = inlined_call_operand.vmem [shape: f32[1,32], index: 8, kind: input, shape index: {}]   ;;  %s2037_s9 = inlined_call_operand.vmem [shape: f32[1,32], index: 9, kind: input, shape index: {}]   ;;  %s2038_s10 = inlined_call_operand.vmem [shape: f32[1,32], index: 10, kind: input, shape index: {}]   ;;  %s2039_s11 = inlined_call_operand.vmem [shape: f32[1,32], index: 11, kind: input, shape index: {}]   ;;  %s2040_s12 = inlined_call_operand.vmem [shape: f32[1,32], index: 12, kind: input, shape index: {}]   ;;  %s2041_s13 = inlined_call_operand.hbm [shape: f32[2,8,32], index: 13, kind: output, shape index: {}]  }
   0x1   :  { %2042 = sst [smem:[#allocation8_spill]] %s2028_s0 }
   0x2   :  { %2043 = sst [smem:[#allocation9_spill]] %s2029_s1 }
   0x3   :  { %2044 = sst [smem:[#allocation10_spill]] %s2030_s2 }
   0x4   :  { %2045 = sst [smem:[#allocation11_spill]] %s2031_s3 }
   0x5   :  { %2046 = sst [smem:[#allocation12_spill]] %s2033_s5 }
   0x6   :  { %18 = vsyncpa [#allocation3], 0 }
   0x7   :  { %19 = vsyncpa [#allocation4], 0 }
   0x8   :  { %21 = vsyncpa [#allocation4 + $0x1], 0  ;;  %s1773_s25 = smov 0   ;;  %s1775_s26 = smov 0  }
   0x9   :  { %s1777_s27 = smov 0   ;;  %s1779_s28 = smov 0  }
   0xa LB: > { %s1794_s29 = sadd.s32 4294967295, %s1687_s28   ;;  %s1349_s30 = sadd.s32 4294967294, %s1687_s28   ;;  %s1687_s28 = sphi %s1779_s28, %s2059_s28   ;;  %s1683_s27 = sphi %s1777_s27, %s2058_s27   ;;  %s1679_s26 = sphi %s1775_s26, %s2057_s26   ;;  %s1675_s25 = sphi %s1773_s25, %s2056_s25  }
   0xb   : > { %s1798_s14 = sadd.s32 1, %s1687_s28   ;;  %s312_s15 = sadd.s32 1, %s1683_s27 }
   0xc   : > { %s309_s16 = ssub.s32 %s1687_s28, %s1798_s14  ;;  %p322_p0 = scmp.ne.s32.totalorder %s1683_s27, %s1679_s26 }
   0xd   : > { %p310_p1 = scmp.eq.s32.totalorder %s309_s16, 0  ;;  %p323_p2 = scmp.eq.s32.totalorder %s1794_s29, 1 }
   0xe   : > { %p328_p3 = scmp.ne.s32.totalorder %s1679_s26, %s1675_s25  ;;  %p329_p4 = scmp.eq.s32.totalorder %s1349_s30, 1 }
   0xf   : > { %s1809_s17 = scalar_select %p310_p1, %s1683_s27, %s312_s15  }
  0x10   : > { %p1811_p5 = por %p323_p2, %p322_p0  ;;  %p1815_p6 = por %p329_p4, %p328_p3 }
  0x11   : > { %p1350_p7 = scmp.ge.s32.totalorder %s1687_s28, 1  ;;  %p336_p8 = scmp.lt.s32.totalorder %s1687_s28, 3 }
  0x12   : > { %s2048_s19 = scalar_select %p1815_p6, 1, 0 }
  0x13   : > { %p1519_p9 = scmp.eq.s32.totalorder %s1794_s29, 0  ;;  %p1822_p10 = pnand %p1350_p7, %p336_p8 }
  0x14   : > { %s1689_s21 = smov [#allocation2]  }
  0x15   : > { %s360_s22 = sshll.u32 %s1689_s21, 4  ;;  %p1511_p11 = pneg %p1822_p10  ;;  %s361_s22 = int_to_ptr.vmem [resolvable:$true] %s360_s22 }
  0x16   : > { %s1608_s23 = scalar_lea.vmem %s361_s22, 256  ;;  %p1616_p3 = scmp.lt.s32.totalorder %s361_s22, %s361_s22 }
  0x17   : > { %p1512_p12 = pnand %p1519_p9, %p1511_p11  ;;  %p1609_p0 = scmp.ne.s32.totalorder %s361_s22, %s1608_s23 }
  0x18   : > { %p1617_p4 = scmp.lt.s32.totalorder %s1608_s23, %s1608_s23 }
  0x19   : > { %p1599_p13 = pneg %p1512_p12 }
  0x1a   : > { %p1618_p6 = por %p1617_p4, %p1616_p3 }
  0x1b   : > { %p1611_p1 = pnand %p1609_p0, %p1599_p13 }
  0x1d   : > { %p1612_p2 = pneg %p1611_p1 }
  0x1f   : > { %p1619_p7 = pnand %p1618_p6, %p1612_p2 }
  0x21   : > { %1622 = shalt.err (!%p1619_p7)
}
  0x22   : > { %s1690_s24 = smov 64   ;;  %s1691_s30 = smov 4  }
  0x23   : > { %s2050_s5 = sld [smem:[#allocation12_spill]] }
  0x25   : > { %404 = sbr.rel (%p1822_p10) target bundleno = 2543 (0x9ef), region = 72 }
  0x29   : > { %1514 = dma.hbm_to_vmem [thread:$0]  (!%p1512_p12), %s2050_s5, 256, %s361_s22, [#allocation3], %s1690_s24, %s1690_s24, %s1691_s30  }
  0x2a   : > { %1666 = dma.done.wait (%p1519_p9), [#allocation3], 256  }
  0x2b   : > { %1668 = vsyncadd (%p1519_p9), [#allocation3], 4294967040  ;;  %p447_p8 = scmp.lt.s32.totalorder %s1794_s29, 1  ;;  %v1692_v0 = vmov 0.0   ;;  %vm1693_vm0 = vmmov 0   ;;  %s2051_s0 = sld [smem:[#allocation8_spill]] }
  0x2c   : > { %1421 = vmatprep.subr.bf16.mxu0 %v1692_v0  ;;  %1425 = vmatprep.mubr.msk.bf16.mxu0 %vm1693_vm0, %v1692_v0  ;;  %s2052_s1 = sld [smem:[#allocation9_spill]]  ;;  %vm477_vm1 = vcmask 261120   ;;  %s1694_s5 = smov 104   ;;  %vm531_vm2 = vcmask 64512   ;;  %vm775_vm3 = vcmask 1043456   ;;  %vm979_vm4 = vcmask 130048  }
  0x2d   : > { %s448_s21 = scalar_select %p447_p8, %s1794_s29, 1  ;;  %1429 = vmatprep.subr.bf16.mxu1 %v1692_v0  ;;  %1431 = vmatprep.mubr.msk.bf16.mxu1 %vm1693_vm0, %v1692_v0  ;;  %vm982_vm5 = vcmask 195584   ;;  %vm1189_vm6 = vcmask 523264  }
  0x2e   : > { %s2053_s2 = sld [smem:[#allocation10_spill]]  ;;  %s1695_s22 = smov 120  }
  0x2f   : > { %s1356_s20 = sshll.u32 %s448_s21, 3  ;;  %s1696_s23 = smov 96  }
  0x30   : > { %s1698_s30 = smov 64   ;;  %s2054_s3 = sld [smem:[#allocation11_spill]] }
  0x31   : > { %s450_s24 = scalar_lea.vmem %s2051_s0, %s1356_s20  ;;  %s1702_s16 = smov [#allocation5]  }
  0x32   : > { %v1567_v1 = vld [vmem:[%s2052_s1 + $0x8] sm:$0xff]   ;;  %v1568_v2 = vld [vmem:[%s2052_s1] sm:$0xff]   ;;  %s1627_s21 = sshll.u32 %s1702_s16, 4  ;;  %s1628_s21 = int_to_ptr.vmem [resolvable:$false] %s1627_s21 }
  0x33   : > { %1422 = vmatpush3.bf16.msra.mxu0 %v1567_v1  ;;  %v1856_v3 = vld [vmem:[%s450_s24] sm:$0xff]  ;;  %s1697_s24 = smov 112  }
  0x34   : > { %1423 = vmatprep.subr.bf16.mxu0 %v1692_v0  ;;  %v453_v4 = vpack.c.bf16 %v1856_v3, %v1856_v3  ;;  %v1357_v5 = vld [vmem:[%s2053_s2] ss:$0 sm:$0xff] }
  0x37   : > { %1424 = vmatpush3.bf16.msra.mxu0 %v1568_v2 }
  0x38   : > { %1435 = vmatprep.subr.bf16.mxu0 %v1692_v0 }
  0x3a   : > { %1426 = vmatmul.mubr.msk.bf16.vlgmr.msra.gmra.mxu0 %vm477_vm1, %v453_v4 }
  0x3b   : > { %1437 = vmatprep.mubr.msk.bf16.mxu0 %vm1693_vm0, %v1692_v0 }
  0xfa   : > { %v515_v6 = vpop.f32.mrf.mxu0 }
  0xfb   : > { %v516_v7 = vadd.f32 %v1357_v5, %v515_v6 }
  0xfc   : > { %v1427_v8 = vpop.f32.mrf.mxu0 }
  0xfd   : > { %v1868_v9 = vpack.c.bf16 %v516_v7, %v516_v7 }
  0xfe   : > { %v518_v10 = vpop.f32.mrf.mxu0 }
  0xff   : > { %527 = vrot.lane.b32.xlu1 %v1868_v9, %s1694_s5  ;;  %523 = vrot.lane.b32.xlu0 %v1868_v9, %s1695_s22  ;;  %s1699_s5 = smov 8   ;;  %s1700_s22 = smov 16  }
 0x100   : > { %v1428_v11 = vpop.f32.mrf.mxu0 }
 0x103   : > { %529 = vrot.lane.b32.xlu1 %v1868_v9, %s1696_s23  ;;  %525 = vrot.lane.b32.xlu0 %v1868_v9, %s1697_s24  ;;  %s444_s24 = sand.u32 1, %s1679_s26  }
 0x171   : > { %v1874_v12 = vpop.permute.xlu1 %527  ;;  %v524_v13 = vpop.permute.xlu0 %523 }
 0x172   : > { %578 = vrot.lane.b32.xlu0 %v524_v13, %s1696_s23 }
 0x175   : > { %v530_v14 = vpop.permute.xlu1 %529  ;;  %v1876_v15 = vpop.permute.xlu0 %525 }
 0x176   : > { %674 = vrot.lane.b32.xlu0 %v1874_v12, %s1696_s23  ;;  %626 = vrot.lane.b32.xlu1 %v1876_v15, %s1696_s23  ;;  %v536_v16 = vsel %vm531_vm2, %v530_v14, 0  ;;  %s1701_s23 = smov 24  }
 0x177   : > { %1430 = vmatpush3.bf16.xpose.msra.mxu1 %v536_v16 }
 0x178   : > { %1441 = vmatprep.subr.bf16.mxu1 %v1692_v0 }
 0x17e   : > { %1432 = vmatmul.mubr.msk.bf16.vlgmr.msra.gmra.mxu1 %vm531_vm2, %v1868_v9 }
 0x17f   : > { %1443 = vmatprep.mubr.msk.bf16.mxu1 %vm1693_vm0, %v1692_v0 }
 0x1e4   : > { %v579_v17 = vpop.permute.xlu0 %578 }
 0x1e5   : > { %v584_v18 = vsel %vm531_vm2, %v579_v17, 0 }
 0x1e6   : > { %1436 = vmatpush3.bf16.xpose.msra.mxu0 %v584_v18 }
 0x1e7   : > { %1447 = vmatprep.subr.bf16.mxu0 %v1692_v0 }
 0x1e8   : > { %v627_v19 = vpop.permute.xlu1 %626  ;;  %v675_v21 = vpop.permute.xlu0 %674 }
 0x1e9   : > { %v632_v20 = vsel %vm531_vm2, %v627_v19, 0  ;;  %v680_v22 = vsel %vm531_vm2, %v675_v21, 0 }
 0x1ea   : > { %1442 = vmatpush3.bf16.xpose.msra.mxu1 %v632_v20 }
 0x1eb   : > { %1453 = vmatprep.subr.bf16.mxu1 %v1692_v0 }
 0x1ed   : > { %1438 = vmatmul.mubr.msk.bf16.vlgmr.msra.gmra.mxu0 %vm531_vm2, %v524_v13 }
 0x1ee   : > { %1448 = vmatpush3.bf16.xpose.msra.mxu0 %v680_v22  ;;  %1449 = vmatprep.mubr.msk.bf16.mxu0 %vm1693_vm0, %v1692_v0 }
 0x1ef   : > { %1459 = vmatprep.subr.bf16.mxu0 %v1692_v0 }
 0x1f1   : > { %1444 = vmatmul.mubr.msk.bf16.vlgmr.msra.gmra.mxu1 %vm531_vm2, %v1876_v15 }
 0x1f2   : > { %1455 = vmatprep.mubr.msk.bf16.mxu1 %vm1693_vm0, %v1692_v0 }
 0x1f5   : > { %1450 = vmatmul.mubr.msk.bf16.vlgmr.msra.gmra.mxu0 %vm531_vm2, %v1874_v12 }
 0x1f6   : > { %1461 = vmatprep.mubr.msk.bf16.mxu0 %vm1693_vm0, %v1692_v0 }
 0x23e   : > { %v572_v23 = vpop.f32.mrf.mxu1 }
 0x23f   : > { %v722_v24 = vsel %vm531_vm2, %v572_v23, -inf }
 0x240   : > { %v1433_v25 = vpop.f32.mrf.mxu1  ;;  %723 = vmax.xlane.f32.xlu1 %v722_v24 }
 0x242   : > { %v575_v26 = vpop.f32.mrf.mxu1 }
 0x244   : > { %v1434_v27 = vpop.f32.mrf.mxu1 }
 0x2ad   : > { %v620_v28 = vpop.f32.mrf.mxu0 }
 0x2ae   : > { %v725_v29 = vsel %vm531_vm2, %v620_v28, -inf }
 0x2af   : > { %726 = vmax.xlane.f32.xlu0 %v725_v29  ;;  %v1439_v30 = vpop.f32.mrf.mxu0  ;;  %v1569_v29 = vld [vmem:[%s2054_s3 + $0x8] sm:$0xff]  }
 0x2b0   : > { %v1570_v30 = vld [vmem:[%s2054_s3] sm:$0xff]   ;;  %s1265_s3 = scalar_lea.sflag [#allocation4], %s444_s24 }
 0x2b1   : > { %v623_v31 = vpop.f32.mrf.mxu0  ;;  %v668_v32 = vpop.f32.mrf.mxu1 }
 0x2b2   : > { %v728_v33 = vsel %vm531_vm2, %v668_v32, -inf }
 0x2b3   : > { %v1445_v34 = vpop.f32.mrf.mxu1  ;;  %729 = vmax.xlane.f32.xlu0 %v728_v33  ;;  %v1440_v35 = vpop.f32.mrf.mxu0 }
 0x2b5   : > { %v671_v36 = vpop.f32.mrf.mxu1  ;;  %v716_v37 = vpop.f32.mrf.mxu0 }
 0x2b6   : > { %v731_v38 = vsel %vm531_vm2, %v716_v37, -inf }
 0x2b7   : > { %v1446_v39 = vpop.f32.mrf.mxu1  ;;  %732 = vmax.xlane.f32.xlu1 %v731_v38  ;;  %v1451_v40 = vpop.f32.mrf.mxu0 }
 0x2b9   : > { %v719_v41 = vpop.f32.mrf.mxu0 }
 0x2bb   : > { %v1452_v42 = vpop.f32.mrf.mxu0 }
 0x2c8   : > { %819 = vrot.lane.b32.xlu1 %v524_v13, %s1698_s30 }
 0x2c9   : > { %770 = vrot.lane.b32.xlu0 %v1868_v9, %s1698_s30  ;;  %v724_v43 = vpop.xlane.xlu1 %723 }
 0x2ca   : > { %v734_v44 = vsub.f32 %v572_v23, %v724_v43 }
 0x2cc   : > { %v738_v45 = vmul.f32 1.442695, %v734_v44 }
 0x2ce   : > { %1577 = vpow2.f32 %v738_v45 }
 0x2db   : > { %v1578_v46 = vpop.eup %1577 }
 0x2dc   : > { %v746_v47 = vsel %vm531_vm2, %v1578_v46, 0.0 }
 0x2e8   : > { %747 = vadd.xlane.f32.xlu0 %v746_v47 }
 0x338   : > { %v727_v48 = vpop.xlane.xlu0 %726 }
 0x339   : > { %v735_v49 = vsub.f32 %v620_v28, %v727_v48 }
 0x33b   : > { %v740_v50 = vmul.f32 1.442695, %v735_v49 }
 0x33c   : > { %v730_v51 = vpop.xlane.xlu0 %729 }
 0x33d   : > { %1579 = vpow2.f32 %v740_v50  ;;  %v736_v52 = vsub.f32 %v668_v32, %v730_v51 }
 0x33f   : > { %v742_v53 = vmul.f32 1.442695, %v736_v52 }
 0x340   : > { %v771_v54 = vpop.permute.xlu0 %770  ;;  %v733_v55 = vpop.xlane.xlu1 %732 }
 0x341   : > { %1581 = vpow2.f32 %v742_v53  ;;  %v777_v56 = vsel %vm775_vm3, %v771_v54, 0  ;;  %v737_v57 = vsub.f32 %v716_v37, %v733_v55  ;;  %v1369_v53 = vld [vmem:[%s2032_s4] ss:$0 sm:$0xff] }
 0x342   : > { %1454 = vmatpush3.bf16.msra.mxu1 %v777_v56 }
 0x343   : > { %v744_v58 = vmul.f32 1.442695, %v737_v57  ;;  %1465 = vmatprep.subr.bf16.mxu1 %v1692_v0 }
 0x344   : > { %v820_v59 = vpop.permute.xlu1 %819 }
 0x345   : > { %1583 = vpow2.f32 %v744_v58  ;;  %v825_v60 = vsel %vm775_vm3, %v820_v59, 0 }
 0x346   : > { %1460 = vmatpush3.bf16.msra.mxu0 %v825_v60 }
 0x347   : > { %1471 = vmatprep.subr.bf16.mxu0 %v1692_v0 }
 0x34a   : > { %v1580_v61 = vpop.eup %1579 }
 0x34b   : > { %v749_v62 = vsel %vm531_vm2, %v1580_v61, 0.0 }
 0x34c   : > { %750 = vadd.xlane.f32.xlu1 %v749_v62 }
 0x34e   : > { %v1582_v63 = vpop.eup %1581 }
 0x34f   : > { %v752_v1 = vsel %vm531_vm2, %v1582_v63, 0.0 }
 0x350   : > { %753 = vadd.xlane.f32.xlu0 %v752_v1 }
 0x352   : > { %v1584_v2 = vpop.eup %1583 }
 0x353   : > { %v755_v4 = vsel %vm531_vm2, %v1584_v2, 0.0 }
 0x354   : > { %756 = vadd.xlane.f32.xlu1 %v755_v4  ;;  %v1571_v4 = vld [vmem:[#allocation2 + $0x8] sm:$0xff]  }
 0x365   : > { %867 = vrot.lane.b32.xlu1 %v1876_v15, %s1698_s30 }
 0x366   : > { %915 = vrot.lane.b32.xlu0 %v1874_v12, %s1698_s30  ;;  %s1355_s30 = sshll.u32 %s444_s24, 3 }
 0x371   : > { %v748_v5 = vpop.xlane.xlu0 %747 }
 0x372   : > { %1585 = vrcp.f32 %v748_v5  ;;  %v1572_v5 = vld [vmem:[#allocation2] sm:$0xff]  }
 0x37f   : > { %v1586_v6 = vpop.eup %1585 }
 0x380   : > { %v762_v7 = vmul.f32 %v1586_v6, %v1578_v46  ;;  %v1574_v6 = vld [vmem:[%s2035_s7 + $0x10] sm:$0xff]  }
 0x382   : > { %v766_v8 = vpack.c.bf16 %v762_v7, %v762_v7 }
 0x384   : > { %1456 = vmatmul.mubr.msk.bf16.vlgmr.msra.gmra.mxu1 %vm531_vm2, %v766_v8 }
 0x385   : > { %1467 = vmatprep.mubr.msk.bf16.mxu1 %vm1693_vm0, %v1692_v0 }
 0x3d5   : > { %v751_v9 = vpop.xlane.xlu1 %750 }
 0x3d6   : > { %1587 = vrcp.f32 %v751_v9 }
 0x3d9   : > { %v754_v10 = vpop.xlane.xlu0 %753 }
 0x3da   : > { %1589 = vrcp.f32 %v754_v10 }
 0x3dd   : > { %v757_v11 = vpop.xlane.xlu1 %756  ;;  %v916_v16 = vpop.permute.xlu0 %915 }
 0x3de   : > { %1591 = vrcp.f32 %v757_v11  ;;  %v921_v19 = vsel %vm775_vm3, %v916_v16, 0  ;;  %v1373_v11 = vld [vmem:[%s2037_s9] ss:$0 sm:$0xff] }
 0x3e1   : > { %v868_v13 = vpop.permute.xlu1 %867 }
 0x3e2   : > { %v873_v14 = vsel %vm775_vm3, %v868_v13, 0 }
 0x3e3   : > { %v1588_v12 = vpop.eup %1587  ;;  %1466 = vmatpush3.bf16.msra.mxu1 %v873_v14  ;;  %v1374_v14 = vld [vmem:[%s2038_s10] ss:$0 sm:$0xff] }
 0x3e4   : > { %v763_v15 = vmul.f32 %v1588_v12, %v1580_v61  ;;  %1477 = vmatprep.subr.bf16.mxu1 %v1692_v0 }
 0x3e6   : > { %v767_v17 = vpack.c.bf16 %v763_v15, %v763_v15 }
 0x3e7   : > { %v1590_v18 = vpop.eup %1589 }
 0x3e8   : > { %1462 = vmatmul.mubr.msk.bf16.vlgmr.msra.gmra.mxu0 %vm531_vm2, %v767_v17  ;;  %v764_v20 = vmul.f32 %v1590_v18, %v1582_v63  ;;  %v1575_v17 = vld [vmem:[%s2035_s7 + $0x8] sm:$0xff]   ;;  %v1576_v18 = vld [vmem:[%s2035_s7] sm:$0xff]  }
 0x3e9   : > { %1472 = vmatpush3.bf16.msra.mxu0 %v921_v19  ;;  %1473 = vmatprep.mubr.msk.bf16.mxu0 %vm1693_vm0, %v1692_v0  ;;  %v1375_v19 = vld [vmem:[%s2034_s6] ss:$0 sm:$0xff] }
 0x3ea   : > { %v768_v21 = vpack.c.bf16 %v764_v20, %v764_v20  ;;  %1485 = vmatprep.subr.bf16.mxu0 %v1692_v0 }
 0x3eb   : > { %v1592_v22 = vpop.eup %1591 }
 0x3ec   : > { %1468 = vmatmul.mubr.msk.bf16.vlgmr.msra.gmra.mxu1 %vm531_vm2, %v768_v21  ;;  %v765_v23 = vmul.f32 %v1592_v22, %v1584_v2 }
 0x3ed   : > { %1481 = vmatprep.mubr.msk.bf16.mxu1 %vm1693_vm0, %v1692_v0  ;;  %1478 = vmatpush3.bf16.msra.mxu1 %v1569_v29 }
 0x3ee   : > { %v769_v24 = vpack.c.bf16 %v765_v23, %v765_v23  ;;  %1479 = vmatprep.subr.bf16.mxu1 %v1692_v0 }
 0x3f0   : > { %1474 = vmatmul.mubr.msk.bf16.vlgmr.msra.gmra.mxu0 %vm531_vm2, %v769_v24 }
 0x3f1   : > { %1489 = vmatprep.mubr.msk.bf16.mxu0 %vm1693_vm0, %v1692_v0  ;;  %1480 = vmatpush3.bf16.msra.mxu1 %v1570_v30 }
 0x3f2   : > { %1493 = vmatprep.subr.bf16.mxu1 %v1692_v0  ;;  %1486 = vmatpush3.bf16.msra.mxu0 %v1571_v4 }
 0x3f3   : > { %1487 = vmatprep.subr.bf16.mxu0 %v1692_v0 }
 0x3f6   : > { %1488 = vmatpush3.bf16.msra.mxu0 %v1572_v5 }
 0x444   : > { %v813_v25 = vpop.f32.mrf.mxu1 }
 0x445   : > { %v963_v47 = vpack.c.bf16 %v813_v25, %v813_v25 }
 0x446   : > { %v1457_v26 = vpop.f32.mrf.mxu1 }
 0x448   : > { %v816_v27 = vpop.f32.mrf.mxu1 }
 0x44a   : > { %v1458_v28 = vpop.f32.mrf.mxu1 }
 0x4a8   : > { %v861_v31 = vpop.f32.mrf.mxu0 }
 0x4a9   : > { %v964_v32 = vpack.c.bf16 %v861_v31, %v861_v31 }
 0x4aa   : > { %v1463_v33 = vpop.f32.mrf.mxu0 }
 0x4ab   : > { %968 = vrot.lane.b32.xlu1 %v964_v32, %s1699_s5  ;;  %s1388_s5 = sshll.u32 %s1794_s29, 7  ;;  %s1629_s29 = scalar_lea.vmem %s1628_s21, 256 }
 0x4ac   : > { %v864_v34 = vpop.f32.mrf.mxu0  ;;  %v909_v35 = vpop.f32.mrf.mxu1  ;;  %s1276_s2 = scalar_lea.hbm %s2041_s13, %s1388_s5 }
 0x4ad   : > { %v965_v36 = vpack.c.bf16 %v909_v35, %v909_v35 }
 0x4ae   : > { %v1464_v37 = vpop.f32.mrf.mxu0  ;;  %v1469_v38 = vpop.f32.mrf.mxu1 }
 0x4af   : > { %971 = vrot.lane.b32.xlu0 %v965_v36, %s1700_s22  ;;  %s446_s22 = scalar_lea.vmem [#allocation5], %s1355_s30 }
 0x4b0   : > { %v912_v39 = vpop.f32.mrf.mxu1  ;;  %v957_v40 = vpop.f32.mrf.mxu0 }
 0x4b1   : > { %v966_v41 = vpack.c.bf16 %v957_v40, %v957_v40 }
 0x4b2   : > { %v1470_v42 = vpop.f32.mrf.mxu1  ;;  %v1475_v43 = vpop.f32.mrf.mxu0 }
 0x4b3   : > { %974 = vrot.lane.b32.xlu1 %v966_v41, %s1701_s23  ;;  %v1385_v43 = vld [vmem:[%s2039_s11] ss:$0 sm:$0xff]  ;;  %s1278_s23 = sshll.u32 %s446_s22, 4  ;;  %s1279_s23 = int_to_ptr.vmem [resolvable:$true] %s1278_s23 }
 0x4b4   : > { %v960_v44 = vpop.f32.mrf.mxu0  ;;  %s1623_s15 = scalar_lea.vmem %s1279_s23, 128  ;;  %p1630_p11 = scmp.lt.s32.totalorder %s1279_s23, %s1628_s21 }
 0x4b5   : > { %p1624_p6 = scmp.ne.s32.totalorder %s1279_s23, %s1623_s15  ;;  %p1631_p12 = scmp.lt.s32.totalorder %s1629_s29, %s1623_s15 }
 0x4b6   : > { %v1476_v45 = vpop.f32.mrf.mxu0 }
 0x4b7   : > { %v1386_v45 = vld [vmem:[%s2040_s12] ss:$0 sm:$0xff]  ;;  %p1625_p9 = pnand %p1624_p6, %p1811_p5  ;;  %p1632_p13 = por %p1631_p12, %p1630_p11 }
 0x4b9   : > { %p1626_p10 = pneg %p1625_p9 }
 0x4bb   : > { %p1633_p0 = pnand %p1632_p13, %p1626_p10 }
 0x51d   : > { %v969_v46 = vpop.permute.xlu1 %968 }
 0x51e   : > { %v978_v49 = vsel %vm531_vm2, %v963_v47, %v969_v46 }
 0x521   : > { %v972_v48 = vpop.permute.xlu0 %971 }
 0x522   : > { %v981_v50 = vsel %vm979_vm4, %v978_v49, %v972_v48 }
 0x525   : > { %v975_v51 = vpop.permute.xlu1 %974 }
 0x526   : > { %v984_v52 = vsel %vm982_vm5, %v981_v50, %v975_v51 }
 0x527   : > { %1482 = vmatmul.mubr.msk.bf16.vlgmr.msra.gmra.mxu1 %vm477_vm1, %v984_v52 }
 0x528   : > { %1501 = vmatprep.mubr.msk.bf16.mxu1 %vm1693_vm0, %v1692_v0 }
 0x5e7   : > { %v1044_v54 = vpop.f32.mrf.mxu1 }
 0x5e8   : > { %v1045_v55 = vadd.f32 %v1369_v53, %v1044_v54 }
 0x5e9   : > { %v1483_v56 = vpop.f32.mrf.mxu1 }
 0x5ea   : > { %v1050_v57 = vadd.f32 %v1045_v55, %v1856_v3  ;;  %v1573_v3 = vld [vmem:[%s2035_s7 + $0x18] sm:$0xff]  }
 0x5eb   : > { %v1047_v58 = vpop.f32.mrf.mxu1  ;;  %1494 = vmatpush3.bf16.msra.mxu1 %v1573_v3 }
 0x5ec   : > { %v1053_v59 = vsel %vm477_vm1, %v1050_v57, 0.0  ;;  %1495 = vmatprep.subr.bf16.mxu1 %v1692_v0 }
 0x5ed   : > { %1054 = vadd.xlane.f32.xlu0 %v1053_v59  ;;  %v1484_v60 = vpop.f32.mrf.mxu1 }
 0x5ef   : > { %1496 = vmatpush3.bf16.msra.mxu1 %v1574_v6 }
 0x5f0   : > { %1497 = vmatprep.subr.bf16.mxu1 %v1692_v0 }
 0x5f3   : > { %1498 = vmatpush3.bf16.msra.mxu1 %v1575_v17 }
 0x5f4   : > { %1499 = vmatprep.subr.bf16.mxu1 %v1692_v0  ;;  %v1379_v0 = vld [vmem:[%s2036_s8] ss:$0 sm:$0xff] }
 0x5f7   : > { %1500 = vmatpush3.bf16.msra.mxu1 %v1576_v18 }
 0x676   : > { %v1055_v61 = vpop.xlane.xlu0 %1054 }
 0x677   : > { %v1057_v62 = vmul.f32 0.03125, %v1055_v61 }
 0x679   : > { %v1058_v63 = vsub.f32 %v1050_v57, %v1057_v62 }
 0x67b   : > { %v1059_v1 = vmul.f32 %v1058_v63, %v1058_v63 }
 0x67d   : > { %v1060_v2 = vsel %vm477_vm1, %v1059_v1, 0.0 }
 0x67e   : > { %1061 = vadd.xlane.f32.xlu1 %v1060_v2 }
 0x707   : > { %v1062_v7 = vpop.xlane.xlu1 %1061 }
 0x708   : > { %v1063_v8 = vmul.f32 0.03125, %v1062_v7 }
 0x70a   : > { %v1064_v9 = vadd.f32 1e-05, %v1063_v8 }
 0x70c   : > { %1593 = vrsqrt.f32 %v1064_v9 }
 0x719   : > { %v1594_v10 = vpop.eup %1593 }
 0x71a   : > { %v1066_v13 = vmul.f32 %v1594_v10, %v1058_v63 }
 0x71c   : > { %v1073_v12 = vmul.f32 %v1373_v11, %v1066_v13 }
 0x71e   : > { %v1080_v15 = vadd.f32 %v1374_v14, %v1073_v12 }
 0x720   : > { %v1081_v16 = vpack.c.bf16 %v1080_v15, %v1080_v15 }
 0x722   : > { %1490 = vmatmul.mubr.msk.bf16.vlgmr.msra.gmra.mxu0 %vm477_vm1, %v1081_v16 }
 0x7e2   : > { %v1142_v20 = vpop.f32.mrf.mxu0 }
 0x7e3   : > { %v1143_v21 = vadd.f32 %v1375_v19, %v1142_v20 }
 0x7e4   : > { %v1491_v22 = vpop.f32.mrf.mxu0 }
 0x7e5   : > { %v1148_v23 = vmax.f32 %v1143_v21, 0.0 }
 0x7e6   : > { %v1145_v24 = vpop.f32.mrf.mxu0 }
 0x7e7   : > { %v1149_v25 = vpack.c.bf16 %v1148_v23, %v1148_v23 }
 0x7e8   : > { %v1492_v26 = vpop.f32.mrf.mxu0 }
 0x7e9   : > { %1502 = vmatmul.mubr.msk.bf16.vlgmr.msra.gmra.mxu1 %vm1189_vm6, %v1149_v25 }
 0x8a9   : > { %v1227_v27 = vpop.f32.mrf.mxu1 }
 0x8aa   : > { %v1228_v28 = vadd.f32 %v1379_v0, %v1227_v27 }
 0x8ab   : > { %v1503_v29 = vpop.f32.mrf.mxu1 }
 0x8ac   : > { %v1233_v30 = vadd.f32 %v1228_v28, %v1080_v15 }
 0x8ad   : > { %v1230_v31 = vpop.f32.mrf.mxu1 }
 0x8ae   : > { %v1236_v32 = vsel %vm477_vm1, %v1233_v30, 0.0 }
 0x8af   : > { %1237 = vadd.xlane.f32.xlu0 %v1236_v32  ;;  %v1504_v33 = vpop.f32.mrf.mxu1 }
 0x938   : > { %v1238_v34 = vpop.xlane.xlu0 %1237 }
 0x939   : > { %v1239_v35 = vmul.f32 0.03125, %v1238_v34 }
 0x93b   : > { %v1240_v36 = vsub.f32 %v1233_v30, %v1239_v35 }
 0x93d   : > { %v1241_v37 = vmul.f32 %v1240_v36, %v1240_v36 }
 0x93f   : > { %v1242_v38 = vsel %vm477_vm1, %v1241_v37, 0.0 }
 0x940   : > { %1243 = vadd.xlane.f32.xlu0 %v1242_v38 }
 0x9c9   : > { %v1244_v39 = vpop.xlane.xlu0 %1243 }
 0x9ca   : > { %v1245_v40 = vmul.f32 0.03125, %v1244_v39 }
 0x9cc   : > { %v1246_v41 = vadd.f32 1e-05, %v1245_v40 }
 0x9ce   : > { %1595 = vrsqrt.f32 %v1246_v41 }
 0x9db   : > { %v1596_v42 = vpop.eup %1595 }
 0x9dc   : > { %v1248_v44 = vmul.f32 %v1596_v42, %v1240_v36 }
 0x9de   : > { %v1255_v46 = vmul.f32 %v1385_v43, %v1248_v44 }
 0x9e0   : > { %v1262_v47 = vadd.f32 %v1386_v45, %v1255_v46 }
 0x9e2   : > { %1263 = vst.msk [vmem:[%s446_s22] sm:$0xff] %vm477_vm1, %v1262_v47 }
 0x9e3   : > { %1636 = shalt.err (!%p1633_p0)
}
 0x9e4   : > { %s1637_s0 = scalar_lea.hbm %s1276_s2, 128  ;;  %s1641_s30 = scalar_lea.hbm %s2041_s13, 256 }
 0x9e5   : > { %p1638_p1 = scmp.ne.s32.totalorder %s1276_s2, %s1637_s0  ;;  %p1642_p4 = scmp.lt.s32.totalorder %s1276_s2, %s2041_s13 }
 0x9e6   : > { %p1643_p7 = scmp.lt.s32.totalorder %s1641_s30, %s1637_s0 }
 0x9e7   : > { %p1639_p2 = pnand %p1638_p1, %p1811_p5 }
 0x9e8   : > { %p1644_p8 = por %p1643_p7, %p1642_p4 }
 0x9e9   : > { %p1640_p3 = pneg %p1639_p2 }
 0x9eb   : > { %p1645_p6 = pnand %p1644_p8, %p1640_p3 }
 0x9ed   : > { %1648 = shalt.err (!%p1645_p6)
}
 0x9ee   : > { %1509 = dma.vmem_to_hbm [thread:$0]  (%p1811_p5), %s1279_s23, 128, %s1276_s2, %s1265_s3  }
 0x9ef PF: > { %p1521_p9 = scmp.ge.s32.totalorder %s1687_s28, 2  ;;  %s1290_s22 = sand.u32 1, %s1675_s25  }
 0x9f0   : > { %p2055_p10 = scmp.ne.s32.totalorder %s2048_s19, 0  ;;  %s1291_s15 = scalar_lea.sflag [#allocation4], %s1290_s22 }
 0x9f2   : > { %p1516_p11 = pnand %p1521_p9, %p2055_p10 }
 0x9f4   : > { %p1517_p12 = pneg %p1516_p11 }
 0x9f6   : > { %1670 = dma.done.wait (%p1517_p12), %s1291_s15, 128  }
 0x9f7   : > { %1672 = vsyncadd (%p1517_p12), %s1291_s15, 4294967168  ;;  %p24_p13 = scmp.ge.s32.totalorder %s1798_s14, 4   ;;  %s2056_s25 = smov %s1679_s26 }
 0x9f8   : > { %s2057_s26 = smov %s1683_s27  ;;  %s2058_s27 = smov %s1809_s17 }
 0x9f9   : > { %s2059_s28 = smov %s1798_s14  ;;  %26 = sbr.rel (!%p24_p13) target bundleno = 10 (0xa), region = 112 }
 0x9fe   :  { %1296 = vsyncpa [#allocation3], 1 }
 0x9ff   :  { %1298 = vsyncpa [#allocation3 + $0x1], 1 }
 0xa00   :  { %1299 = vsyncpa [#allocation4], 1 }
 0xa01   :  { %1301 = vsyncpa [#allocation4 + $0x1], 1 }

</bundles_post_ra>
